<compile_context>
chip_gen: v7x
topology: tpu7x:2x2x1
jax: 0.10.0
libtpu: 0.0.40
codegen_flags: <defaults>
</compile_context>

<pallas_src>
import numpy as np
import jax
import jax.numpy as jnp
from jax.experimental import pallas as pl
from jax.experimental.pallas import tpu as pltpu

EPS = 1e-5

# MXU operand dtype.  f32 (default MXU precision) keeps the 1e-2 validation
# tight at this toy size; at production channel counts on v6e/v7x flip to
# jnp.bfloat16 (keep preferred_element_type / BN statistics in f32, elementwise
# math stays f32 for v5e) and re-validate tolerances.
MXU_DTYPE = jnp.float32


# --------------------------------- kernel ----------------------------------
def resblock_kernel(x_ref, mtop_ref, mbot_ref, a1_ref, b1sc_ref,
                    a2_ref, cb2_ref, q_ref, g1_ref, bb1_ref,
                    g2_ref, bb2_ref, out_ref):
    """Whole ResidualBlock on one lane-dense (N*H, W*C) slab.

    x_ref     : (N*H, W*Cin)        input, w-major / channel-minor lanes
    mtop/mbot : (N*H, 1)            0/1 masks for the h-1 / h+1 stencil rows
    a1_ref    : (3, W*Cin, 2*W*Cout) banded weights, [conv1 | shortcut] lanes
    a2_ref    : (3, W*Cout, W*Cout)  banded weights for conv2
    b1sc/cb2  : (1, 2*W*Cout) / (1, W*Cout)  conv biases tiled W times
    q_ref     : (W*Cout, W*Cout)    kron(ones(W,W), I_Cout)/(N*H*W) pooling
    g*/bb*    : (1, W*Cout)         BN gamma / beta tiled W times
    out_ref   : (N*H, W*Cout)
    """
    f32 = jnp.float32
    nh = x_ref.shape[0]
    wcout = out_ref.shape[1]

    mtop = mtop_ref[...]          # zero where h == 0
    mbot = mbot_ref[...]          # zero where h == H-1

    def shifted3(t):
        # Stencil rows h-1, h, h+1.  pltpu.roll is a sublane rotation (XLU);
        # its wrap across image/batch boundaries hits exactly the rows the
        # masks zero out, so no halo buffer is ever materialized.
        up = pltpu.roll(t, 1, 0) * mtop         # row h-1
        dn = pltpu.roll(t, nh - 1, 0) * mbot    # row h+1
        return up, t, dn

    def conv3x3(t, a_ref, bias_row):
        # One MXU dot per stencil row; column (w) shifts and the 'same'
        # padding along W are baked into the banded weight matrices.
        t0, t1, t2 = shifted3(t)
        acc = jnp.dot(t0.astype(MXU_DTYPE), a_ref[0], preferred_element_type=f32)
        acc += jnp.dot(t1.astype(MXU_DTYPE), a_ref[1], preferred_element_type=f32)
        acc += jnp.dot(t2.astype(MXU_DTYPE), a_ref[2], preferred_element_type=f32)
        return acc + bias_row

    def batchnorm(y, gamma_t, beta_t):
        # PyTorch training-mode BN (biased variance, eps=1e-5) evaluated in
        # the lane-dense layout: sublane column sums + a tiny pooling matmul
        # give per-channel stats already tiled W times for broadcast; gamma
        # is folded into the rsqrt scale; the centered tensor is reused.
        q = q_ref[...]
        mean_t = jnp.dot(jnp.sum(y, axis=0, keepdims=True), q,
                         preferred_element_type=f32)
        cent = y - mean_t
        var_t = jnp.dot(jnp.sum(cent * cent, axis=0, keepdims=True), q,
                        preferred_element_type=f32)
        return cent * (gamma_t * jax.lax.rsqrt(var_t + EPS)) + beta_t

    # conv1 + conv_shortcut share the shifted inputs -> the same three dots;
    # the split is at a 128-lane vreg boundary (first W*Cout lanes = conv1).
    h = conv3x3(x_ref[...], a1_ref, b1sc_ref[...])        # (N*H, 2*W*Cout)
    h1 = h[:, :wcout]
    residual = h[:, wcout:]

    h1 = jnp.maximum(batchnorm(h1, g1_ref[...], bb1_ref[...]), 0.0)
    h2 = conv3x3(h1, a2_ref, cb2_ref[...])
    h2 = batchnorm(h2, g2_ref[...], bb2_ref[...])

    # Residual add + ReLU + store, all at full 128-lane width.
    out_ref[...] = jnp.maximum(h2 + residual, 0.0).astype(out_ref.dtype)


# ----------------------------- host-side prep ------------------------------
def _band_stack(w_hwio, width):
    """HWIO (3,3,Ci,Co) -> (3, width*Ci, width*Co) block-banded matrices A_ky
    so that, for x laid out as (N*H, W*Ci) (w-major, channel-minor lanes),
    (row-shifted x) @ A_ky accumulates stencil row ky with 'same' padding
    along W baked into the band structure (out-of-range w' blocks are zero)."""
    mats = []
    for ky in range(3):
        a = None
        for kx in range(3):
            # D_kx[w', w] = 1 iff w' = w + kx - 1  (np.eye offset k = 1 - kx)
            d = jnp.asarray(np.eye(width, width, 1 - kx), jnp.float32)
            blk = jnp.kron(d, w_hwio[ky, kx].astype(jnp.float32))
            a = blk if a is None else a + blk
        mats.append(a)
    return jnp.stack(mats)


def prepare_resblock_params(params, N, H, W, Cin, Cout):
    """One-time packing of module parameters into kernel operands (in real use
    cache this per parameter set; it is pure host-side layout plumbing)."""
    del Cin
    m = N * H * W

    # conv1 and shortcut fused along the output-lane axis.
    a1 = jnp.concatenate([_band_stack(params["w1"], W),
                          _band_stack(params["wsc"], W)], axis=-1)
    a2 = _band_stack(params["w2"], W)

    def tile_w(v):  # per-channel (Cout,) -> (1, W*Cout), hoisted once
        return jnp.tile(jnp.reshape(v, (-1,)).astype(jnp.float32), W)[None, :]

    b1sc = jnp.concatenate([tile_w(params["b1"]), tile_w(params["bsc"])],
                           axis=-1)

    # Per-channel stat pooling: (column sums) @ q = per-channel mean already
    # tiled W times along lanes.
    q = jnp.asarray(np.kron(np.ones((W, W)), np.eye(Cout)) / m, jnp.float32)

    # Border masks for the row (h) shifts (replaces the physical zero halo).
    hh = np.arange(N * H) % H
    mtop = jnp.asarray((hh != 0).astype(np.float32)[:, None])       # h-1 valid
    mbot = jnp.asarray((hh != H - 1).astype(np.float32)[:, None])   # h+1 valid

    return dict(a1=a1.astype(MXU_DTYPE), a2=a2.astype(MXU_DTYPE), b1sc=b1sc,
                cb2=tile_w(params["b2"]), q=q,
                g1=tile_w(params["g1"]), bb1=tile_w(params["be1"]),
                g2=tile_w(params["g2"]), bb2=tile_w(params["be2"]),
                mtop=mtop, mbot=mbot)


# -------------------------------- wrappers ----------------------------------
def residual_block_nhwc(x_nhwc, params):
    """Hot path: NHWC in / NHWC out.  Only contiguous reshapes to/from the
    kernel's lane-dense 2-D layout — no transposes."""
    N, H, W, Cin = x_nhwc.shape
    Cout = int(params["w1"].shape[-1])
    nh, wcout = N * H, W * Cout

    prep = prepare_resblock_params(params, N, H, W, Cin, Cout)
    x2d = x_nhwc.astype(jnp.float32).reshape(nh, W * Cin)

    args = (x2d, prep["mtop"], prep["mbot"], prep["a1"], prep["b1sc"],
            prep["a2"], prep["cb2"], prep["q"], prep["g1"], prep["bb1"],
            prep["g2"], prep["bb2"])

    flops = int(6 * nh * (W * Cin) * (2 * wcout)   # conv1 + shortcut (3 dots)
                + 6 * nh * wcout * wcout           # conv2 (3 dots)
                + 8 * wcout * wcout                # BN stat pooling matmuls
                + 30 * nh * wcout)                 # elementwise tail
    bytes_accessed = int(sum(int(np.prod(a.shape)) * a.dtype.itemsize
                             for a in args) + nh * wcout * 4)

    # Single program: the whole problem fits comfortably in VMEM at this size.
    # NOTE: at production channel counts, switch to a grid over (N*H) row
    # blocks with dimension_semantics=("parallel",) (uses v7x's 2nd
    # TensorCore), two-pass BN statistics, bf16 MXU operands (MXU_DTYPE), and
    # an explicit pltpu.CompilerParams(vmem_limit_bytes=...) budget against
    # v7x's 64 MiB VMEM; the banded weights would then become per-kx weight
    # slabs / proper im2col tiles since (W*C)^2 no longer stays tiny.
    out2d = pl.pallas_call(
        resblock_kernel,
        out_shape=jax.ShapeDtypeStruct((nh, wcout), jnp.float32),
        in_specs=[pl.BlockSpec(memory_space=pltpu.MemorySpace.VMEM)] * len(args),
        out_specs=pl.BlockSpec(memory_space=pltpu.MemorySpace.VMEM),
        cost_estimate=pl.CostEstimate(flops=flops, transcendentals=2 * wcout,
                                      bytes_accessed=bytes_accessed),
    )(*args)
    return out2d.reshape(N, H, W, Cout)


def residual_block(x_nchw, params):
    """NCHW adapter matching the PyTorch module interface (test/interop only;
    the transposes are deliberately kept out of residual_block_nhwc)."""
    x_nhwc = jnp.transpose(x_nchw, (0, 2, 3, 1))
    out_nhwc = residual_block_nhwc(x_nhwc, params)
    return jnp.transpose(out_nhwc, (0, 3, 1, 2))


# ------------------------- deterministic parameters -------------------------
def init_params(key, cin, cout):
    def conv_init(k, ci, co):
        fan_in = ci * 9
        bound = 1.0 / np.sqrt(fan_in)  # PyTorch Conv2d default-init bound
        kw, kb = jax.random.split(k)
        w = jax.random.uniform(kw, (3, 3, ci, co), jnp.float32, -bound, bound)
        b = jax.random.uniform(kb, (1, co), jnp.float32, -bound, bound)
        return w, b

    k1, k2, k3 = jax.random.split(key, 3)
    w1, b1 = conv_init(k1, cin, cout)
    w2, b2 = conv_init(k2, cout, cout)
    wsc, bsc = conv_init(k3, cin, cout)
    return dict(
        w1=w1, b1=b1, g1=jnp.ones((1, cout), jnp.float32),
        be1=jnp.zeros((1, cout), jnp.float32),
        w2=w2, b2=b2, g2=jnp.ones((1, cout), jnp.float32),
        be2=jnp.zeros((1, cout), jnp.float32),
        wsc=wsc, bsc=bsc,
    )


# ------------------------------ pure-JAX ref --------------------------------
def ref_forward(x_nchw, p):
    def conv(x, w, b):
        y = jax.lax.conv_general_dilated(
            x, w, window_strides=(1, 1), padding=((1, 1), (1, 1)),
            dimension_numbers=("NCHW", "HWIO", "NCHW"))
        return y + b.reshape(1, -1, 1, 1)

    def bn(y, g, beta):
        mean = jnp.mean(y, axis=(0, 2, 3), keepdims=True)
        var = jnp.mean((y - mean) ** 2, axis=(0, 2, 3), keepdims=True)
        return ((y - mean) * jax.lax.rsqrt(var + EPS) * g.reshape(1, -1, 1, 1)
                + beta.reshape(1, -1, 1, 1))

    residual = conv(x_nchw, p["wsc"], p["bsc"])
    out = jnp.maximum(bn(conv(x_nchw, p["w1"], p["b1"]), p["g1"], p["be1"]), 0)
    out = bn(conv(out, p["w2"], p["b2"]), p["g2"], p["be2"])
    return jnp.maximum(out + residual, 0)


# ---------------------------------- main ------------------------------------
if __name__ == "__main__":
    key = jax.random.PRNGKey(0)
    kx, kp = jax.random.split(key)

    N, Cin, Cout, H, W = 2, 4, 8, 16, 16
    x = jax.random.normal(kx, (N, Cin, H, W), jnp.float32)
    params = init_params(kp, Cin, Cout)

    out = jax.block_until_ready(residual_block(x, params))
    ref = jax.block_until_ready(ref_forward(x, params))

    # Tolerance accommodates default-precision MXU matmul vs. XLA conv
    # reduction-order differences at f32.
    np.testing.assert_allclose(np.asarray(out), np.asarray(ref),
                               rtol=1e-2, atol=1e-2)

    print("KERNEL_OK")
</pallas_src>

<mosaic_0001>
module attributes {stable_mosaic.version = 11 : i64} {
  func.func @resblock_kernel(%arg0: memref<32x64xf32, #tpu.memory_space<vmem>>, %arg1: memref<32x1xf32, #tpu.memory_space<vmem>>, %arg2: memref<32x1xf32, #tpu.memory_space<vmem>>, %arg3: memref<3x64x256xf32, #tpu.memory_space<vmem>>, %arg4: memref<1x256xf32, #tpu.memory_space<vmem>>, %arg5: memref<3x128x128xf32, #tpu.memory_space<vmem>>, %arg6: memref<1x128xf32, #tpu.memory_space<vmem>>, %arg7: memref<128x128xf32, #tpu.memory_space<vmem>>, %arg8: memref<1x128xf32, #tpu.memory_space<vmem>>, %arg9: memref<1x128xf32, #tpu.memory_space<vmem>>, %arg10: memref<1x128xf32, #tpu.memory_space<vmem>>, %arg11: memref<1x128xf32, #tpu.memory_space<vmem>>, %arg12: memref<32x128xf32, #tpu.memory_space<vmem>>) attributes {dimension_semantics = [], scalar_prefetch = 0 : i64, scratch_operands = 0 : i64, tpu.core_type = #tpu.core_type<tc>} {
    %c0 = arith.constant 0 : index
    %c0_0 = arith.constant 0 : index
    %0 = vector.load %arg1[%c0, %c0_0] : memref<32x1xf32, #tpu.memory_space<vmem>>, vector<32x1xf32>
    %c0_1 = arith.constant 0 : index
    %c0_2 = arith.constant 0 : index
    %1 = vector.load %arg2[%c0_1, %c0_2] : memref<32x1xf32, #tpu.memory_space<vmem>>, vector<32x1xf32>
    %c0_3 = arith.constant 0 : index
    %c0_4 = arith.constant 0 : index
    %2 = vector.load %arg0[%c0_3, %c0_4] : memref<32x64xf32, #tpu.memory_space<vmem>>, vector<32x64xf32>
    %c0_5 = arith.constant 0 : index
    %c0_6 = arith.constant 0 : index
    %3 = vector.load %arg4[%c0_5, %c0_6] : memref<1x256xf32, #tpu.memory_space<vmem>>, vector<1x256xf32>
    %c1_i32 = arith.constant 1 : i32
    %4 = tpu.dynamic_rotate %2 by %c1_i32 dim 0 : vector<32x64xf32>, i32 -> vector<32x64xf32>
    %5 = vector.broadcast %0 : vector<32x1xf32> to vector<32x64xf32>
    %6 = arith.mulf %4, %5 : vector<32x64xf32>
    %c31_i32 = arith.constant 31 : i32
    %7 = tpu.dynamic_rotate %2 by %c31_i32 dim 0 : vector<32x64xf32>, i32 -> vector<32x64xf32>
    %8 = vector.broadcast %1 : vector<32x1xf32> to vector<32x64xf32>
    %9 = arith.mulf %7, %8 : vector<32x64xf32>
    %c0_7 = arith.constant 0 : index
    %c0_8 = arith.constant 0 : index
    %c0_9 = arith.constant 0 : index
    %10 = vector.load %arg3[%c0_7, %c0_8, %c0_9] : memref<3x64x256xf32, #tpu.memory_space<vmem>>, vector<1x64x256xf32>
    %11 = vector.shape_cast %10 : vector<1x64x256xf32> to vector<64x256xf32>
    %cst = arith.constant dense<0.000000e+00> : vector<32x256xf32>
    %12 = tpu.matmul %6, %11, %cst {dimension_numbers = #tpu.dot_dimension_numbers<[1], [0], [0], [1], [0, 0, 1, 1], [], []>} : vector<32x64xf32>, vector<64x256xf32>, vector<32x256xf32> -> vector<32x256xf32>
    %c1 = arith.constant 1 : index
    %c0_10 = arith.constant 0 : index
    %c0_11 = arith.constant 0 : index
    %13 = vector.load %arg3[%c1, %c0_10, %c0_11] : memref<3x64x256xf32, #tpu.memory_space<vmem>>, vector<1x64x256xf32>
    %14 = vector.shape_cast %13 : vector<1x64x256xf32> to vector<64x256xf32>
    %cst_12 = arith.constant dense<0.000000e+00> : vector<32x256xf32>
    %15 = tpu.matmul %2, %14, %cst_12 {dimension_numbers = #tpu.dot_dimension_numbers<[1], [0], [0], [1], [0, 0, 1, 1], [], []>} : vector<32x64xf32>, vector<64x256xf32>, vector<32x256xf32> -> vector<32x256xf32>
    %16 = arith.addf %12, %15 : vector<32x256xf32>
    %c2 = arith.constant 2 : index
    %c0_13 = arith.constant 0 : index
    %c0_14 = arith.constant 0 : index
    %17 = vector.load %arg3[%c2, %c0_13, %c0_14] : memref<3x64x256xf32, #tpu.memory_space<vmem>>, vector<1x64x256xf32>
    %18 = vector.shape_cast %17 : vector<1x64x256xf32> to vector<64x256xf32>
    %cst_15 = arith.constant dense<0.000000e+00> : vector<32x256xf32>
    %19 = tpu.matmul %9, %18, %cst_15 {dimension_numbers = #tpu.dot_dimension_numbers<[1], [0], [0], [1], [0, 0, 1, 1], [], []>} : vector<32x64xf32>, vector<64x256xf32>, vector<32x256xf32> -> vector<32x256xf32>
    %20 = arith.addf %16, %19 : vector<32x256xf32>
    %21 = vector.broadcast %3 : vector<1x256xf32> to vector<32x256xf32>
    %22 = arith.addf %20, %21 : vector<32x256xf32>
    %23 = vector.extract_strided_slice %22 {offsets = [0, 0], sizes = [32, 128], strides = [1, 1]} : vector<32x256xf32> to vector<32x128xf32>
    %24 = vector.extract_strided_slice %22 {offsets = [0, 128], sizes = [32, 128], strides = [1, 1]} : vector<32x256xf32> to vector<32x128xf32>
    %c0_16 = arith.constant 0 : index
    %c0_17 = arith.constant 0 : index
    %25 = vector.load %arg8[%c0_16, %c0_17] : memref<1x128xf32, #tpu.memory_space<vmem>>, vector<1x128xf32>
    %c0_18 = arith.constant 0 : index
    %c0_19 = arith.constant 0 : index
    %26 = vector.load %arg9[%c0_18, %c0_19] : memref<1x128xf32, #tpu.memory_space<vmem>>, vector<1x128xf32>
    %c0_20 = arith.constant 0 : index
    %c0_21 = arith.constant 0 : index
    %27 = vector.load %arg7[%c0_20, %c0_21] : memref<128x128xf32, #tpu.memory_space<vmem>>, vector<128x128xf32>
    %cst_22 = arith.constant dense<0.000000e+00> : vector<128xf32>
    %28 = vector.multi_reduction <add>, %23, %cst_22 [0] : vector<32x128xf32> to vector<128xf32>
    %29 = vector.shape_cast %28 : vector<128xf32> to vector<1x128xf32>
    %cst_23 = arith.constant dense<0.000000e+00> : vector<1x128xf32>
    %30 = tpu.matmul %29, %27, %cst_23 {dimension_numbers = #tpu.dot_dimension_numbers<[1], [0], [0], [1], [0, 0, 1, 1], [], []>} : vector<1x128xf32>, vector<128x128xf32>, vector<1x128xf32> -> vector<1x128xf32>
    %31 = vector.broadcast %30 : vector<1x128xf32> to vector<32x128xf32>
    %32 = arith.subf %23, %31 : vector<32x128xf32>
    %33 = arith.mulf %32, %32 : vector<32x128xf32>
    %cst_24 = arith.constant dense<0.000000e+00> : vector<128xf32>
    %34 = vector.multi_reduction <add>, %33, %cst_24 [0] : vector<32x128xf32> to vector<128xf32>
    %35 = vector.shape_cast %34 : vector<128xf32> to vector<1x128xf32>
    %cst_25 = arith.constant dense<0.000000e+00> : vector<1x128xf32>
    %36 = tpu.matmul %35, %27, %cst_25 {dimension_numbers = #tpu.dot_dimension_numbers<[1], [0], [0], [1], [0, 0, 1, 1], [], []>} : vector<1x128xf32>, vector<128x128xf32>, vector<1x128xf32> -> vector<1x128xf32>
    %cst_26 = arith.constant 9.99999974E-6 : f32
    %37 = vector.broadcast %cst_26 : f32 to vector<1x128xf32>
    %38 = arith.addf %36, %37 : vector<1x128xf32>
    %39 = math.rsqrt %38 : vector<1x128xf32>
    %40 = arith.mulf %25, %39 : vector<1x128xf32>
    %41 = vector.broadcast %40 : vector<1x128xf32> to vector<32x128xf32>
    %42 = arith.mulf %32, %41 : vector<32x128xf32>
    %43 = vector.broadcast %26 : vector<1x128xf32> to vector<32x128xf32>
    %44 = arith.addf %42, %43 : vector<32x128xf32>
    %cst_27 = arith.constant 0.000000e+00 : f32
    %45 = vector.broadcast %cst_27 : f32 to vector<32x128xf32>
    %46 = arith.maximumf %44, %45 : vector<32x128xf32>
    %c0_28 = arith.constant 0 : index
    %c0_29 = arith.constant 0 : index
    %47 = vector.load %arg6[%c0_28, %c0_29] : memref<1x128xf32, #tpu.memory_space<vmem>>, vector<1x128xf32>
    %c1_i32_30 = arith.constant 1 : i32
    %48 = tpu.dynamic_rotate %46 by %c1_i32_30 dim 0 : vector<32x128xf32>, i32 -> vector<32x128xf32>
    %49 = vector.broadcast %0 : vector<32x1xf32> to vector<32x128xf32>
    %50 = arith.mulf %48, %49 : vector<32x128xf32>
    %c31_i32_31 = arith.constant 31 : i32
    %51 = tpu.dynamic_rotate %46 by %c31_i32_31 dim 0 : vector<32x128xf32>, i32 -> vector<32x128xf32>
    %52 = vector.broadcast %1 : vector<32x1xf32> to vector<32x128xf32>
    %53 = arith.mulf %51, %52 : vector<32x128xf32>
    %c0_32 = arith.constant 0 : index
    %c0_33 = arith.constant 0 : index
    %c0_34 = arith.constant 0 : index
    %54 = vector.load %arg5[%c0_32, %c0_33, %c0_34] : memref<3x128x128xf32, #tpu.memory_space<vmem>>, vector<1x128x128xf32>
    %55 = vector.shape_cast %54 : vector<1x128x128xf32> to vector<128x128xf32>
    %cst_35 = arith.constant dense<0.000000e+00> : vector<32x128xf32>
    %56 = tpu.matmul %50, %55, %cst_35 {dimension_numbers = #tpu.dot_dimension_numbers<[1], [0], [0], [1], [0, 0, 1, 1], [], []>} : vector<32x128xf32>, vector<128x128xf32>, vector<32x128xf32> -> vector<32x128xf32>
    %c1_36 = arith.constant 1 : index
    %c0_37 = arith.constant 0 : index
    %c0_38 = arith.constant 0 : index
    %57 = vector.load %arg5[%c1_36, %c0_37, %c0_38] : memref<3x128x128xf32, #tpu.memory_space<vmem>>, vector<1x128x128xf32>
    %58 = vector.shape_cast %57 : vector<1x128x128xf32> to vector<128x128xf32>
    %cst_39 = arith.constant dense<0.000000e+00> : vector<32x128xf32>
    %59 = tpu.matmul %46, %58, %cst_39 {dimension_numbers = #tpu.dot_dimension_numbers<[1], [0], [0], [1], [0, 0, 1, 1], [], []>} : vector<32x128xf32>, vector<128x128xf32>, vector<32x128xf32> -> vector<32x128xf32>
    %60 = arith.addf %56, %59 : vector<32x128xf32>
    %c2_40 = arith.constant 2 : index
    %c0_41 = arith.constant 0 : index
    %c0_42 = arith.constant 0 : index
    %61 = vector.load %arg5[%c2_40, %c0_41, %c0_42] : memref<3x128x128xf32, #tpu.memory_space<vmem>>, vector<1x128x128xf32>
    %62 = vector.shape_cast %61 : vector<1x128x128xf32> to vector<128x128xf32>
    %cst_43 = arith.constant dense<0.000000e+00> : vector<32x128xf32>
    %63 = tpu.matmul %53, %62, %cst_43 {dimension_numbers = #tpu.dot_dimension_numbers<[1], [0], [0], [1], [0, 0, 1, 1], [], []>} : vector<32x128xf32>, vector<128x128xf32>, vector<32x128xf32> -> vector<32x128xf32>
    %64 = arith.addf %60, %63 : vector<32x128xf32>
    %65 = vector.broadcast %47 : vector<1x128xf32> to vector<32x128xf32>
    %66 = arith.addf %64, %65 : vector<32x128xf32>
    %c0_44 = arith.constant 0 : index
    %c0_45 = arith.constant 0 : index
    %67 = vector.load %arg10[%c0_44, %c0_45] : memref<1x128xf32, #tpu.memory_space<vmem>>, vector<1x128xf32>
    %c0_46 = arith.constant 0 : index
    %c0_47 = arith.constant 0 : index
    %68 = vector.load %arg11[%c0_46, %c0_47] : memref<1x128xf32, #tpu.memory_space<vmem>>, vector<1x128xf32>
    %c0_48 = arith.constant 0 : index
    %c0_49 = arith.constant 0 : index
    %69 = vector.load %arg7[%c0_48, %c0_49] : memref<128x128xf32, #tpu.memory_space<vmem>>, vector<128x128xf32>
    %cst_50 = arith.constant dense<0.000000e+00> : vector<128xf32>
    %70 = vector.multi_reduction <add>, %66, %cst_50 [0] : vector<32x128xf32> to vector<128xf32>
    %71 = vector.shape_cast %70 : vector<128xf32> to vector<1x128xf32>
    %cst_51 = arith.constant dense<0.000000e+00> : vector<1x128xf32>
    %72 = tpu.matmul %71, %69, %cst_51 {dimension_numbers = #tpu.dot_dimension_numbers<[1], [0], [0], [1], [0, 0, 1, 1], [], []>} : vector<1x128xf32>, vector<128x128xf32>, vector<1x128xf32> -> vector<1x128xf32>
    %73 = vector.broadcast %72 : vector<1x128xf32> to vector<32x128xf32>
    %74 = arith.subf %66, %73 : vector<32x128xf32>
    %75 = arith.mulf %74, %74 : vector<32x128xf32>
    %cst_52 = arith.constant dense<0.000000e+00> : vector<128xf32>
    %76 = vector.multi_reduction <add>, %75, %cst_52 [0] : vector<32x128xf32> to vector<128xf32>
    %77 = vector.shape_cast %76 : vector<128xf32> to vector<1x128xf32>
    %cst_53 = arith.constant dense<0.000000e+00> : vector<1x128xf32>
    %78 = tpu.matmul %77, %69, %cst_53 {dimension_numbers = #tpu.dot_dimension_numbers<[1], [0], [0], [1], [0, 0, 1, 1], [], []>} : vector<1x128xf32>, vector<128x128xf32>, vector<1x128xf32> -> vector<1x128xf32>
    %cst_54 = arith.constant 9.99999974E-6 : f32
    %79 = vector.broadcast %cst_54 : f32 to vector<1x128xf32>
    %80 = arith.addf %78, %79 : vector<1x128xf32>
    %81 = math.rsqrt %80 : vector<1x128xf32>
    %82 = arith.mulf %67, %81 : vector<1x128xf32>
    %83 = vector.broadcast %82 : vector<1x128xf32> to vector<32x128xf32>
    %84 = arith.mulf %74, %83 : vector<32x128xf32>
    %85 = vector.broadcast %68 : vector<1x128xf32> to vector<32x128xf32>
    %86 = arith.addf %84, %85 : vector<32x128xf32>
    %87 = arith.addf %86, %24 : vector<32x128xf32>
    %cst_55 = arith.constant 0.000000e+00 : f32
    %88 = vector.broadcast %cst_55 : f32 to vector<32x128xf32>
    %89 = arith.maximumf %87, %88 : vector<32x128xf32>
    %c0_56 = arith.constant 0 : index
    %c0_57 = arith.constant 0 : index
    %90 = vector.load %arg12[%c0_56, %c0_57] : memref<32x128xf32, #tpu.memory_space<vmem>>, vector<32x128xf32>
    tpu.vector_store %arg12[%c0_56, %c0_57], %89 {strides = array<i32>} : memref<32x128xf32, #tpu.memory_space<vmem>>, vector<32x128xf32>,
    return
  }
}

</mosaic_0001>

<bundles_post_ra>
// kernel: tpu_custom_call.1
= control target key start
LH: loop header
LB: loop body
LE: loop exit
PB: predicated region body
PF: predicated region fallthrough
CT: control target
= control target key end

     0   :  { %17 = vsyncpa [#allocation3], 0  ;;  %s2570_s0 = inlined_call_operand.vmem [shape: f32[32,64], index: 0, kind: input, shape index: {}]   ;;  %s2571_s1 = inlined_call_operand.vmem [shape: f32[32,1], index: 1, kind: input, shape index: {}]   ;;  %s2572_s2 = inlined_call_operand.vmem [shape: f32[32,1], index: 2, kind: input, shape index: {}]   ;;  %s2573_s3 = inlined_call_operand.hbm [shape: f32[3,64,256], index: 3, kind: input, shape index: {}]   ;;  %s2574_s4 = inlined_call_operand.vmem [shape: f32[1,256], index: 4, kind: input, shape index: {}]   ;;  %s2575_s5 = inlined_call_operand.hbm [shape: f32[3,128,128], index: 5, kind: input, shape index: {}]   ;;  %s2576_s6 = inlined_call_operand.vmem [shape: f32[1,128], index: 6, kind: input, shape index: {}]   ;;  %s2577_s7 = inlined_call_operand.hbm [shape: f32[128,128], index: 7, kind: input, shape index: {}]   ;;  %s2578_s8 = inlined_call_operand.vmem [shape: f32[1,128], index: 8, kind: input, shape index: {}]   ;;  %s2579_s9 = inlined_call_operand.vmem [shape: f32[1,128], index: 9, kind: input, shape index: {}]   ;;  %s2580_s10 = inlined_call_operand.vmem [shape: f32[1,128], index: 10, kind: input, shape index: {}]   ;;  %s2581_s11 = inlined_call_operand.vmem [shape: f32[1,128], index: 11, kind: input, shape index: {}]   ;;  %s2582_s12 = inlined_call_operand.hbm [shape: f32[32,128], index: 12, kind: output, shape index: {}]  }
   0x1   :  { %18 = vsyncpa [#allocation6], 0 }
   0x2   :  { %19 = vsyncpa [#allocation4], 0  ;;  %s2100_s21 = smov [#allocation5]   ;;  %s2006_s25 = scalar_lea.hbm %s2575_s5, 6144 }
   0x3   :  { %s45_s22 = sshll.u32 %s2100_s21, 4  ;;  %p2007_p0 = scmp.ne.s32.totalorder %s2575_s5, %s2006_s25  ;;  %s46_s22 = int_to_ptr.vmem [resolvable:$true] %s45_s22 }
   0x4   :  { %p2010_p1 = scmp.lt.u32.totalorder %s2006_s25, %s2575_s5 }
   0x6   :  { %p2012_p2 = pnand %p2010_p1, %p2007_p0 }
   0x8   :  { %2015 = shalt.err (!%p2012_p2)
}
   0x9   :  { %s2016_s30 = scalar_lea.vmem %s46_s22, 6144  ;;  %p2021_p4 = scmp.lt.s32.totalorder %s46_s22, %s46_s22 }
   0xa   :  { %p2017_p3 = scmp.ne.s32.totalorder %s46_s22, %s2016_s30  ;;  %p2022_p5 = scmp.lt.s32.totalorder %s2016_s30, %s2016_s30 }
   0xc   :  { %p2023_p6 = por %p2022_p5, %p2021_p4 }
   0xe   :  { %p2024_p7 = pnand %p2023_p6, %p2017_p3 }
  0x10   :  { %2027 = shalt.err (!%p2024_p7)
}
  0x11   :  { %s2101_s13 = smov 128   ;;  %s2102_s14 = smov 8  }
  0x12   :  { %51 = dma.hbm_to_vmem [thread:$0]  %s2575_s5, 6144, %s46_s22, [#allocation6], %s2101_s13, %s2101_s13, %s2102_s14  }
  0x13   :  { %s2103_s17 = smov [#allocation2]   ;;  %s2028_s21 = scalar_lea.hbm %s2573_s3, 6144 }
  0x14   :  { %s31_s18 = sshll.u32 %s2103_s17, 4  ;;  %p2029_p8 = scmp.ne.s32.totalorder %s2573_s3, %s2028_s21  ;;  %s32_s18 = int_to_ptr.vmem [resolvable:$true] %s31_s18 }
  0x15   :  { %p2032_p9 = scmp.lt.u32.totalorder %s2028_s21, %s2573_s3 }
  0x17   :  { %p2034_p10 = pnand %p2032_p9, %p2029_p8 }
  0x19   :  { %2037 = shalt.err (!%p2034_p10)
}
  0x1a   :  { %s2038_s27 = scalar_lea.vmem %s32_s18, 6144  ;;  %p2043_p12 = scmp.lt.s32.totalorder %s32_s18, %s32_s18 }
  0x1b   :  { %p2039_p11 = scmp.ne.s32.totalorder %s32_s18, %s2038_s27  ;;  %p2044_p13 = scmp.lt.s32.totalorder %s2038_s27, %s2038_s27 }
  0x1d   :  { %p2045_p0 = por %p2044_p13, %p2043_p12 }
  0x1f   :  { %p2046_p1 = pnand %p2045_p0, %p2039_p11 }
  0x21   :  { %2049 = shalt.err (!%p2046_p1)
}
  0x22   :  { %s2104_s5 = smov 256   ;;  %s2105_s22 = smov 16  }
  0x23   :  { %37 = dma.hbm_to_vmem [thread:$0]  %s2573_s3, 6144, %s32_s18, [#allocation3], %s2104_s5, %s2104_s5, %s2105_s22  }
  0x24   :  { %s2106_s30 = smov [#allocation7]   ;;  %s2050_s19 = scalar_lea.hbm %s2577_s7, 2048 }
  0x25   :  { %s59_s15 = sshll.u32 %s2106_s30, 4  ;;  %p2051_p2 = scmp.ne.s32.totalorder %s2577_s7, %s2050_s19  ;;  %s60_s15 = int_to_ptr.vmem [resolvable:$true] %s59_s15 }
  0x26   :  { %p2054_p3 = scmp.lt.u32.totalorder %s2050_s19, %s2577_s7 }
  0x28   :  { %p2056_p4 = pnand %p2054_p3, %p2051_p2 }
  0x2a   :  { %2059 = shalt.err (!%p2056_p4)
}
  0x2b   :  { %s2060_s25 = scalar_lea.vmem %s60_s15, 2048  ;;  %p2065_p6 = scmp.lt.s32.totalorder %s60_s15, %s60_s15 }
  0x2c   :  { %p2061_p5 = scmp.ne.s32.totalorder %s60_s15, %s2060_s25  ;;  %p2066_p7 = scmp.lt.s32.totalorder %s2060_s25, %s2060_s25 }
  0x2e   :  { %p2067_p8 = por %p2066_p7, %p2065_p6 }
  0x30   :  { %p2068_p9 = pnand %p2067_p8, %p2061_p5 }
  0x32   :  { %2071 = shalt.err (!%p2068_p9)
}
  0x33   :  { %65 = dma.hbm_to_vmem [thread:$0]  %s2577_s7, 2048, %s60_s15, [#allocation6], %s2101_s13, %s2101_s13, %s2102_s14  }
  0x34   :  { %2094 = dma.done.wait [#allocation3], 6144  }
  0x35   :  { %2095 = vsyncadd [#allocation3], 4294961152 }
  0x36   :  { %2096 = dma.done.wait [#allocation6], 8192  }
  0x37   :  { %2097 = vsyncadd [#allocation6], 4294959104  ;;  %v2107_v0 = vmov 0   ;;  %v85_v1 = vld [vmem:[%s2571_s1 + $0x10] sm:$0xff]  ;;  %v83_v2 = vld [vmem:[%s2571_s1] sm:$0xff]  ;;  %v100_v3 = vlaneseq  ;;  %v2108_v7 = vmov 0.0  }
  0x38   :  { %2001 = vset.pattern.permute.xlu1 %v2107_v0  ;;  %2000 = vset.pattern.permute.xlu0 %v2107_v0  ;;  %v86_v4 = vld [vmem:[%s2571_s1 + $0x18] sm:$0xff]  ;;  %v84_v5 = vld [vmem:[%s2571_s1 + $0x8] sm:$0xff]  ;;  %v164_v9 = vld [vmem:[#allocation2] sm:$0xff]  ;;  %vm197_vm2 = vcmask 523264   ;;  %vm2110_vm3 = vmmov 0   ;;  %s2111_s16 = smov [#allocation8]  }
  0x39   :  { %119 = vperm.xlu1 %2001, %v85_v1   ;;  %109 = vperm.xlu0 %2000, %v83_v2   ;;  %v165_v6 = vld [vmem:[#allocation2 + $0x8] sm:$0xff]  ;;  %v167_v8 = vld [vmem:[#allocation2 + $0x18] sm:$0xff]  ;;  %v166_v10 = vld [vmem:[#allocation2 + $0x10] sm:$0xff]  ;;  %v2233_v16 = vshrl.u32 %v100_v3, 7  ;;  %s1314_s17 = sshll.u32 %s2111_s16, 4  ;;  %s1315_s17 = int_to_ptr.vmem [resolvable:$true] %s1314_s17 }
  0x3a   :  { %375 = vmatprep.mubr.f32.mxu0 %v2108_v7  ;;  %274 = vmatprep.mubr.f32.mxu1 %v2108_v7  ;;  %v1740_v11 = vpack.c.bf16 %v167_v8, %v165_v6  ;;  %v1742_v12 = vpack.c.bf16 %v166_v10, %v164_v9  ;;  %v169_v13 = vld [vmem:[#allocation2 + $0x28] sm:$0xff]  ;;  %v171_v14 = vld [vmem:[#allocation2 + $0x38] sm:$0xff]  ;;  %v168_v15 = vld [vmem:[#allocation2 + $0x20] sm:$0xff]  ;;  %p2077_p11 = scmp.lt.s32.totalorder %s1315_s17, %s1315_s17 }
  0x3b   :  { %v1744_v17 = vpack.c.bf16 %v171_v14, %v169_v13  ;;  %v170_v18 = vld [vmem:[#allocation2 + $0x30] sm:$0xff]  ;;  %v173_v19 = vld [vmem:[#allocation2 + $0x48] sm:$0xff]  ;;  %v175_v20 = vld [vmem:[#allocation2 + $0x58] sm:$0xff]  ;;  %vm102_vm0 = vcmp.lt.s32.totalorder %v2233_v16, 1  ;;  %vm135_vm1 = vcmp.lt.s32.totalorder %v2233_v16, 7 }
  0x3c   :  { %v88_v21 = vld [vmem:[%s2572_s2 + $0x8] sm:$0xff]  ;;  %v87_v22 = vld [vmem:[%s2572_s2] sm:$0xff]  ;;  %1741 = vmatprep.subr.bf16.mxu0 %v1740_v11  ;;  %v1746_v24 = vpack.c.bf16 %v170_v18, %v168_v15  ;;  %v174_v25 = vld [vmem:[#allocation2 + $0x50] sm:$0xff]  ;;  %v1748_v28 = vpack.c.bf16 %v175_v20, %v173_v19 }
  0x3d   :  { %124 = vperm.xlu1 %2001, %v86_v4   ;;  %114 = vperm.xlu0 %2000, %v84_v5   ;;  %v172_v23 = vld [vmem:[#allocation2 + $0x40] sm:$0xff]  ;;  %v177_v26 = vld [vmem:[#allocation2 + $0x68] sm:$0xff]  ;;  %v179_v27 = vld [vmem:[#allocation2 + $0x78] sm:$0xff] }
  0x3e   :  { %1743 = vmatpush1.bf16.msra.mxu0 %v1742_v12  ;;  %v2244_v29 = vld [vmem:[%s2570_s0 + $0x8] sm:$0xff]  ;;  %v2249_v30 = vld [vmem:[%s2570_s0 + $0x10] sm:$0xff]  ;;  %v2255_v31 = vld [vmem:[%s2570_s0] sm:$0xff]  ;;  %v1750_v45 = vpack.c.bf16 %v174_v25, %v172_v23  ;;  %v1752_v52 = vpack.c.bf16 %v179_v27, %v177_v26 }
  0x3f   :  { %1745 = vmatprep.subr.bf16.mxu0 %v1744_v17  ;;  %v97_v32 = vrot.slane %v2244_v29, 7  ;;  %v98_v33 = vrot.slane %v2249_v30, 7  ;;  %v2263_v34 = vld [vmem:[%s2570_s0 + $0x18] sm:$0xff]  ;;  %v96_v35 = vrot.slane %v2255_v31, 7  ;;  %v182_v36 = vld [vmem:[#allocation2 + $0x88] sm:$0xff]  ;;  %v89_v39 = vld [vmem:[%s2572_s2 + $0x10] sm:$0xff] }
  0x40   :  { %v184_v37 = vld [vmem:[#allocation2 + $0x98] sm:$0xff]  ;;  %v99_v40 = vrot.slane %v2263_v34, 7  ;;  %v181_v42 = vld [vmem:[#allocation2 + $0x80] sm:$0xff]  ;;  %v132_v43 = vrot.slane %v2244_v29, 1  ;;  %v133_v44 = vrot.slane %v2249_v30, 1  ;;  %v178_v47 = vld [vmem:[#allocation2 + $0x70] sm:$0xff] }
  0x41   :  { %147 = vperm.xlu1 %2001, %v88_v21   ;;  %142 = vperm.xlu0 %2000, %v87_v22   ;;  %v90_v38 = vld [vmem:[%s2572_s2 + $0x18] sm:$0xff]  ;;  %v1724_v41 = vpack.c.bf16 %v184_v37, %v182_v36  ;;  %v176_v46 = vld [vmem:[#allocation2 + $0x60] sm:$0xff]  ;;  %v2277_v48 = vsel %vm102_vm0, %v97_v32, %v98_v33  ;;  %v183_v49 = vld [vmem:[#allocation2 + $0x90] sm:$0xff]  ;;  %v2281_v50 = vsel %vm102_vm0, %v96_v35, %v97_v32  ;;  %v131_v51 = vrot.slane %v2255_v31, 1 }
  0x42   :  { %1747 = vmatpush1.bf16.msra.mxu0 %v1746_v24  ;;  %v106_v53 = vsel %vm102_vm0, %v99_v40, %v96_v35  ;;  %v402_v54 = vld [vmem:[#allocation2 + $0x108] sm:$0xff]  ;;  %v1726_v55 = vpack.c.bf16 %v183_v49, %v181_v42  ;;  %v188_v57 = vld [vmem:[#allocation2 + $0xb8] sm:$0xff]  ;;  %v134_v58 = vrot.slane %v2263_v34, 1  ;;  %v2289_v60 = vsel %vm102_vm0, %v98_v33, %v99_v40  ;;  %v185_v62 = vld [vmem:[#allocation2 + $0xa0] sm:$0xff] }
  0x43   :  { %1749 = vmatprep.subr.bf16.mxu0 %v1748_v28  ;;  %1725 = vmatprep.subr.bf16.mxu1 %v1724_v41  ;;  %v186_v56 = vld [vmem:[#allocation2 + $0xa8] sm:$0xff]  ;;  %v404_v59 = vld [vmem:[#allocation2 + $0x118] sm:$0xff]  ;;  %v187_v63 = vld [vmem:[#allocation2 + $0xb0] sm:$0xff]  ;;  %v2293_v0 = vsel %vm135_vm1, %v132_v43, %v133_v44  ;;  %v2297_v2 = vsel %vm135_vm1, %v131_v51, %v132_v43  ;;  %v1754_v5 = vpack.c.bf16 %v178_v47, %v176_v46  ;;  %v2109_v21 = vmov 0.0|0.0  }
  0x44   :  { %v1728_v61 = vpack.c.bf16 %v188_v57, %v186_v56  ;;  %1727 = vmatpush1.bf16.msra.mxu1 %v1726_v55  ;;  %v1730_v1 = vpack.c.bf16 %v187_v63, %v185_v62  ;;  %v190_v3 = vld [vmem:[#allocation2 + $0xc8] sm:$0xff]  ;;  %v2301_v4 = vsel %vm135_vm1, %v134_v58, %v131_v51  ;;  %v192_v6 = vld [vmem:[#allocation2 + $0xd8] sm:$0xff]  ;;  %v2305_v8 = vsel %vm135_vm1, %v133_v44, %v134_v58  ;;  %v189_v11 = vld [vmem:[#allocation2 + $0xc0] sm:$0xff] }
  0x45   :  { %157 = vperm.xlu1 %2001, %v90_v38   ;;  %152 = vperm.xlu0 %2000, %v89_v39   ;;  %v1756_v9 = vpack.c.bf16 %v404_v59, %v402_v54  ;;  %v1732_v10 = vpack.c.bf16 %v192_v6, %v190_v3  ;;  %v191_v12 = vld [vmem:[#allocation2 + $0xd0] sm:$0xff]  ;;  %v194_v13 = vld [vmem:[#allocation2 + $0xe8] sm:$0xff]  ;;  %v196_v14 = vld [vmem:[#allocation2 + $0xf8] sm:$0xff] }
  0x46   :  { %1751 = vmatpush1.bf16.msra.mxu0 %v1750_v45  ;;  %1729 = vmatprep.subr.bf16.mxu1 %v1728_v61  ;;  %v1734_v15 = vpack.c.bf16 %v191_v12, %v189_v11  ;;  %v1736_v17 = vpack.c.bf16 %v196_v14, %v194_v13  ;;  %v193_v18 = vld [vmem:[#allocation2 + $0xe0] sm:$0xff]  ;;  %v195_v19 = vld [vmem:[#allocation2 + $0xf0] sm:$0xff]  ;;  %v406_v24 = vld [vmem:[#allocation2 + $0x128] sm:$0xff] }
  0x47   :  { %1753 = vmatprep.subr.bf16.mxu0 %v1752_v52  ;;  %v1738_v20 = vpack.c.bf16 %v195_v19, %v193_v18  ;;  %v401_v22 = vld [vmem:[#allocation2 + $0x100] sm:$0xff]  ;;  %v403_v23 = vld [vmem:[#allocation2 + $0x110] sm:$0xff]  ;;  %v408_v25 = vld [vmem:[#allocation2 + $0x138] sm:$0xff] }
  0x48   :  { %1731 = vmatpush1.bf16.msra.mxu1 %v1730_v1  ;;  %v1758_v27 = vpack.c.bf16 %v403_v23, %v401_v22  ;;  %v410_v32 = vld [vmem:[#allocation2 + $0x148] sm:$0xff]  ;;  %v412_v33 = vld [vmem:[#allocation2 + $0x158] sm:$0xff]  ;;  %v409_v38 = vld [vmem:[#allocation2 + $0x140] sm:$0xff] }
  0x49   :  { %1733 = vmatprep.subr.bf16.mxu1 %v1732_v10  ;;  %v1764_v37 = vpack.c.bf16 %v412_v33, %v410_v32  ;;  %v411_v39 = vld [vmem:[#allocation2 + $0x150] sm:$0xff]  ;;  %v414_v41 = vld [vmem:[#allocation2 + $0x168] sm:$0xff]  ;;  %v416_v42 = vld [vmem:[#allocation2 + $0x178] sm:$0xff] }
  0x4a   :  { %1755 = vmatpush1.bf16.msra.mxu0 %v1754_v5  ;;  %v1766_v44 = vpack.c.bf16 %v411_v39, %v409_v38  ;;  %v1768_v45 = vpack.c.bf16 %v416_v42, %v414_v41  ;;  %v413_v46 = vld [vmem:[#allocation2 + $0x160] sm:$0xff]  ;;  %v415_v47 = vld [vmem:[#allocation2 + $0x170] sm:$0xff]  ;;  %v550_v63 = vld [vmem:[#allocation7 + $0x18] sm:$0xff]  ;;  %v2404_v39 = vsub.s32 0, %v2233_v16 }
  0x4b   :  { %1757 = vmatprep.subr.bf16.mxu0 %v1756_v9  ;;  %v547_v59 = vld [vmem:[#allocation7] sm:$0xff]  ;;  %v549_v62 = vld [vmem:[#allocation7 + $0x10] sm:$0xff]  ;;  %v554_v5 = vld [vmem:[#allocation7 + $0x38] sm:$0xff] }
  0x4c   :  { %1735 = vmatpush1.bf16.msra.mxu1 %v1734_v15  ;;  %v551_v1 = vld [vmem:[#allocation7 + $0x20] sm:$0xff]  ;;  %v556_v11 = vld [vmem:[#allocation7 + $0x48] sm:$0xff]  ;;  %v557_v15 = vld [vmem:[#allocation7 + $0x50] sm:$0xff] }
  0x4d   :  { %1737 = vmatprep.subr.bf16.mxu1 %v1736_v17  ;;  %v555_v10 = vld [vmem:[#allocation7 + $0x40] sm:$0xff]  ;;  %v558_v17 = vld [vmem:[#allocation7 + $0x58] sm:$0xff]  ;;  %v560_v23 = vld [vmem:[#allocation7 + $0x68] sm:$0xff] }
  0x4e   :  { %v2381_v13 = vpack.c.bf16 %v556_v11, %v555_v10  ;;  %v2385_v19 = vpack.c.bf16 %v558_v17, %v557_v15  ;;  %v559_v22 = vld [vmem:[#allocation7 + $0x60] sm:$0xff] }
  0x4f   :  { %v95_v32 = vld [vmem:[%s2574_s4] sm:$0x3] }
  0x50   :  { %1739 = vmatpush1.bf16.msra.mxu1 %v1738_v20 }
  0x51   :  { %1772 = vmatprep.subr.bf16.mxu1 %v2109_v21 }
  0x53   :  { %1327 = vmatmul.mubr.msk.f32.vlgmr.msra.gmra.mrb[0].mxu1 %vm197_vm2, %v2255_v31  ;;  %v405_v31 = vld [vmem:[#allocation2 + $0x120] sm:$0xff] }
  0x54   :  { %280 = vmatprep.mubr.f32.mxu1 %v2108_v7 }
  0x57   :  { %1328 = vmatmul.mubr.msk.f32.gmra.mrb[2].mxu1 %vm197_vm2, %v2244_v29  ;;  %v1760_v29 = vpack.c.bf16 %v408_v25, %v406_v24  ;;  %v2389_v25 = vpack.c.bf16 %v560_v23, %v559_v22  ;;  %v802_v22 = vld [vmem:[#allocation5 + $0x88] sm:$0xff]  ;;  %v803_v23 = vld [vmem:[#allocation5 + $0x90] sm:$0xff] }
  0x58   :  { %286 = vmatprep.mubr.f32.mxu1 %v2108_v7 }
  0x5b   :  { %1329 = vmatmul.mubr.msk.f32.gmra.mrb[4].mxu1 %vm197_vm2, %v2249_v30  ;;  %v407_v30 = vld [vmem:[#allocation2 + $0x130] sm:$0xff] }
  0x5c   :  { %292 = vmatprep.mubr.f32.mxu1 %v2108_v7  ;;  %v1762_v35 = vpack.c.bf16 %v407_v30, %v405_v31  ;;  %v533_v30 = vsub.s32 1, %v2233_v16 }
  0x5f   :  { %1330 = vmatmul.mubr.msk.f32.gmra.mrb[6].mxu1 %vm197_vm2, %v2263_v34 }
  0x60   :  { %1502 = vmatprep.mubr.msk.f32.mxu1 %vm2110_vm3, %v2108_v7 }
  0xb8   :  { %v2319_v26 = vpop.permute.xlu0 %109  ;;  %v2328_v40 = vpop.permute.xlu1 %119 }
  0xb9   :  { %v127_v28 = vmul.f32 %v2319_v26, %v106_v53  ;;  %v129_v43 = vmul.f32 %v2328_v40, %v2277_v48 }
  0xbb   :  { %1331 = vmatmul.mubr.msk.f32.vlgmr.msra.gmra.mrb[0].mxu0 %vm197_vm2, %v127_v28  ;;  %v561_v28 = vld [vmem:[#allocation7 + $0x70] sm:$0xff] }
  0xbc   :  { %1759 = vmatpush1.bf16.msra.mxu0 %v1758_v27  ;;  %v2323_v34 = vpop.permute.xlu0 %114  ;;  %381 = vmatprep.mubr.f32.mxu0 %v2108_v7  ;;  %v2335_v49 = vpop.permute.xlu1 %124 }
  0xbd   :  { %v128_v36 = vmul.f32 %v2323_v34, %v2281_v50  ;;  %1761 = vmatprep.subr.bf16.mxu0 %v1760_v29  ;;  %v1770_v50 = vpack.c.bf16 %v415_v47, %v413_v46  ;;  %v130_v48 = vmul.f32 %v2335_v49, %v2289_v60  ;;  %v548_v60 = vld [vmem:[#allocation7 + $0x8] sm:$0xff]  ;;  %v562_v29 = vld [vmem:[#allocation7 + $0x78] sm:$0xff]  ;;  %v530_v46 = vrot.slane %v95_v32, %v2404_v39 }
  0xbe   :  { %v2365_v61 = vpack.c.bf16 %v548_v60, %v547_v59  ;;  %v2393_v31 = vpack.c.bf16 %v562_v29, %v561_v28 }
  0xbf   :  { %1332 = vmatmul.mubr.msk.f32.gmra.mrb[2].mxu0 %vm197_vm2, %v128_v36 }
  0xc0   :  { %1763 = vmatpush1.bf16.msra.mxu0 %v1762_v35  ;;  %387 = vmatprep.mubr.f32.mxu0 %v2108_v7  ;;  %v2340_v51 = vpop.permute.xlu0 %142  ;;  %v2346_v53 = vpop.permute.xlu1 %147  ;;  %v534_v35 = vrot.slane %v95_v32, %v533_v30 }
  0xc1   :  { %1765 = vmatprep.subr.bf16.mxu0 %v1764_v37  ;;  %v160_v52 = vmul.f32 %v2340_v51, %v2297_v2  ;;  %v161_v54 = vmul.f32 %v2346_v53, %v2293_v0  ;;  %1774 = vmatpush3.bf16.msra.mxu1 %v2365_v61  ;;  %v2369_v0 = vpack.c.bf16 %v550_v63, %v549_v62  ;;  %v552_v2 = vld [vmem:[#allocation7 + $0x28] sm:$0xff] }
  0xc2   :  { %1775 = vmatprep.subr.bf16.mxu1 %v2109_v21  ;;  %v2373_v3 = vpack.c.bf16 %v552_v2, %v551_v1 }
  0xc3   :  { %1333 = vmatmul.mubr.msk.f32.gmra.mrb[4].mxu0 %vm197_vm2, %v129_v43 }
  0xc4   :  { %1767 = vmatpush1.bf16.msra.mxu0 %v1766_v44  ;;  %393 = vmatprep.mubr.f32.mxu0 %v2108_v7  ;;  %v2352_v55 = vpop.permute.xlu0 %152  ;;  %v2358_v57 = vpop.permute.xlu1 %157 }
  0xc5   :  { %1769 = vmatprep.subr.bf16.mxu0 %v1768_v45  ;;  %v162_v56 = vmul.f32 %v2352_v55, %v2305_v8  ;;  %v163_v58 = vmul.f32 %v2358_v57, %v2301_v4  ;;  %1777 = vmatpush3.bf16.msra.mxu1 %v2369_v0  ;;  %v553_v4 = vld [vmem:[#allocation7 + $0x30] sm:$0xff] }
  0xc6   :  { %1778 = vmatprep.subr.bf16.mxu1 %v2109_v21  ;;  %v2377_v8 = vpack.c.bf16 %v554_v5, %v553_v4 }
  0xc7   :  { %1334 = vmatmul.mubr.msk.f32.gmra.mrb[6].mxu0 %vm197_vm2, %v130_v48 }
  0xc8   :  { %1771 = vmatpush1.bf16.msra.mxu0 %v1770_v50  ;;  %493 = vmatprep.mubr.f32.mxu0 %v2108_v7 }
  0xc9   :  { %1780 = vmatpush3.bf16.msra.mxu1 %v2373_v3 }
  0xca   :  { %1781 = vmatprep.subr.bf16.mxu1 %v2109_v21 }
  0xcb   :  { %1335 = vmatmul.mubr.msk.f32.vlgmr.msra.gmra.mrb[0].mxu0 %vm197_vm2, %v160_v52 }
  0xcc   :  { %499 = vmatprep.mubr.f32.mxu0 %v2108_v7 }
  0xcd   :  { %1783 = vmatpush3.bf16.msra.mxu1 %v2377_v8 }
  0xce   :  { %1784 = vmatprep.subr.bf16.mxu1 %v2109_v21 }
  0xcf   :  { %1336 = vmatmul.mubr.msk.f32.gmra.mrb[2].mxu0 %vm197_vm2, %v161_v54 }
  0xd0   :  { %505 = vmatprep.mubr.f32.mxu0 %v2108_v7 }
  0xd1   :  { %1786 = vmatpush3.bf16.msra.mxu1 %v2381_v13 }
  0xd2   :  { %1787 = vmatprep.subr.bf16.mxu1 %v2109_v21 }
  0xd3   :  { %1337 = vmatmul.mubr.msk.f32.gmra.mrb[4].mxu0 %vm197_vm2, %v162_v56 }
  0xd4   :  { %511 = vmatprep.mubr.f32.mxu0 %v2108_v7 }
  0xd5   :  { %1789 = vmatpush3.bf16.msra.mxu1 %v2385_v19 }
  0xd6   :  { %1790 = vmatprep.subr.bf16.mxu1 %v2109_v21 }
  0xd7   :  { %1338 = vmatmul.mubr.msk.f32.gmra.mrb[6].mxu0 %vm197_vm2, %v163_v58 }
  0xd9   :  { %1792 = vmatpush3.bf16.msra.mxu1 %v2389_v25 }
  0xda   :  { %1793 = vmatprep.subr.bf16.mxu1 %v2109_v21 }
  0xdd   :  { %1795 = vmatpush3.bf16.msra.mxu1 %v2393_v31 }
  0xde   :  { %1796 = vmatprep.subr.bf16.mxu1 %v2109_v21 }
 0x126   :  { %v276_v6 = vpop.f32.mrb[0].mxu1 }
 0x127   :  { %v278_v9 = vpop.f32.mrb[1].mxu1 }
 0x12a   :  { %v282_v12 = vpop.f32.mrb[2].mxu1 }
 0x12b   :  { %v284_v14 = vpop.f32.mrb[3].mxu1 }
 0x12e   :  { %v288_v18 = vpop.f32.mrb[4].mxu1 }
 0x12f   :  { %v290_v20 = vpop.f32.mrb[5].mxu1 }
 0x132   :  { %v294_v24 = vpop.f32.mrb[6].mxu1 }
 0x133   :  { %v296_v27 = vpop.f32.mrb[7].mxu1 }
 0x19e   :  { %v495_v33 = vpop.f32.mrb[0].mxu0 }
 0x19f   :  { %v1964_v36 = vadd.f32 %v495_v33, %v276_v6  ;;  %v497_v37 = vpop.f32.mrb[1].mxu0 }
 0x1a0   :  { %v1965_v38 = vadd.f32 %v497_v37, %v278_v9 }
 0x1a1   :  { %v537_v58 = vadd.f32 %v1964_v36, %v530_v46 }
 0x1a2   :  { %v2406_v41 = vadd.f32 %v1965_v38, %v534_v35  ;;  %v501_v42 = vpop.f32.mrb[2].mxu0 }
 0x1a3   :  { %v1966_v43 = vadd.f32 %v501_v42, %v282_v12  ;;  %v503_v44 = vpop.f32.mrb[3].mxu0 }
 0x1a4   :  { %v1967_v45 = vadd.f32 %v503_v44, %v284_v14 }
 0x1a5   :  { %v539_v48 = vadd.f32 %v1966_v43, %v530_v46 }
 0x1a6   :  { %v2409_v47 = vadd.f32 %v1967_v45, %v534_v35  ;;  %v507_v50 = vpop.f32.mrb[4].mxu0 }
 0x1a7   :  { %v1968_v52 = vadd.f32 %v507_v50, %v288_v18  ;;  %v509_v54 = vpop.f32.mrb[5].mxu0  ;;  %v563_v63 = vadd.f32 %v539_v48, %v537_v58 }
 0x1a8   :  { %v1969_v56 = vadd.f32 %v509_v54, %v290_v20  ;;  %v801_v20 = vld [vmem:[#allocation5 + $0x80] sm:$0xff] }
 0x1a9   :  { %v541_v59 = vadd.f32 %v1968_v52, %v530_v46 }
 0x1aa   :  { %v2411_v60 = vadd.f32 %v1969_v56, %v534_v35  ;;  %v513_v62 = vpop.f32.mrb[6].mxu0 }
 0x1ab   :  { %v1970_v1 = vadd.f32 %v513_v62, %v294_v24  ;;  %v515_v2 = vpop.f32.mrb[7].mxu0  ;;  %v564_v5 = vadd.f32 %v563_v63, %v541_v59  ;;  %v1820_v24 = vpack.c.bf16 %v802_v22, %v801_v20  ;;  %v805_v62 = vld [vmem:[#allocation5 + $0xa0] sm:$0xff]  ;;  %v806_v63 = vld [vmem:[#allocation5 + $0xa8] sm:$0xff]  ;;  %v815_v22 = vld [vmem:[#allocation5 + $0xf0] sm:$0xff] }
 0x1ac   :  { %v1971_v4 = vadd.f32 %v515_v2, %v296_v27  ;;  %v804_v27 = vld [vmem:[#allocation5 + $0x98] sm:$0xff]  ;;  %v807_v2 = vld [vmem:[#allocation5 + $0xb0] sm:$0xff] }
 0x1ad   :  { %v543_v6 = vadd.f32 %v1970_v1, %v530_v46  ;;  %v1824_v28 = vpack.c.bf16 %v804_v27, %v803_v23  ;;  %1821 = vmatprep.subr.bf16.mxu0 %v1820_v24  ;;  %v1828_v1 = vpack.c.bf16 %v806_v63, %v805_v62  ;;  %v816_v23 = vld [vmem:[#allocation5 + $0xf8] sm:$0xff]  ;;  %v784_v27 = vld [vmem:[#allocation5] sm:$0xff]  ;;  %v786_v62 = vld [vmem:[#allocation5 + $0x10] sm:$0xff] }
 0x1ae   :  { %v2413_v9 = vadd.f32 %v1971_v4, %v534_v35  ;;  %1823 = vmatpush3.bf16.msra.mxu0 %v1820_v24  ;;  %v808_v4 = vld [vmem:[#allocation5 + $0xb8] sm:$0xff]  ;;  %v1848_v24 = vpack.c.bf16 %v816_v23, %v815_v22  ;;  %v793_v22 = vld [vmem:[#allocation5 + $0x48] sm:$0xff] }
 0x1af   :  { %v565_v10 = vadd.f32 %v564_v5, %v543_v6  ;;  %1825 = vmatprep.subr.bf16.mxu0 %v1824_v28  ;;  %v1832_v5 = vpack.c.bf16 %v808_v4, %v807_v2  ;;  %v787_v63 = vld [vmem:[#allocation5 + $0x18] sm:$0xff] }
 0x1b1   :  { %v566_v11 = vrot.slane %v565_v10, 4 }
 0x1b2   :  { %1827 = vmatpush3.bf16.msra.mxu0 %v1824_v28  ;;  %v785_v28 = vld [vmem:[#allocation5 + $0x8] sm:$0xff] }
 0x1b3   :  { %v567_v12 = vadd.f32 %v566_v11, %v565_v10  ;;  %1829 = vmatprep.subr.bf16.mxu0 %v1828_v1  ;;  %v810_v10 = vld [vmem:[#allocation5 + $0xc8] sm:$0xff] }
 0x1b5   :  { %v568_v14 = vrot.slane %v567_v12, 2 }
 0x1b6   :  { %1831 = vmatpush3.bf16.msra.mxu0 %v1828_v1 }
 0x1b7   :  { %v569_v15 = vadd.f32 %v568_v14, %v567_v12  ;;  %1833 = vmatprep.subr.bf16.mxu0 %v1832_v5  ;;  %v811_v12 = vld [vmem:[#allocation5 + $0xd0] sm:$0xff]  ;;  %v812_v14 = vld [vmem:[#allocation5 + $0xd8] sm:$0xff] }
 0x1b9   :  { %v570_v17 = vrot.slane %v569_v15, 1 }
 0x1ba   :  { %1835 = vmatpush3.bf16.msra.mxu0 %v1832_v5 }
 0x1bb   :  { %v571_v18 = vadd.f32 %v570_v17, %v569_v15  ;;  %v1840_v15 = vpack.c.bf16 %v812_v14, %v811_v12  ;;  %v813_v17 = vld [vmem:[#allocation5 + $0xe0] sm:$0xff] }
 0x1bd   :  { %1503 = vmatmul.mubr.f32.vlgmr.msra.gmra.mrb[8].mxu1 %v571_v18  ;;  %v814_v18 = vld [vmem:[#allocation5 + $0xe8] sm:$0xff] }
 0x1be   :  { %1798 = vmatpush3.bf16.msra.mxu1 %v2365_v61  ;;  %1537 = vmatprep.mubr.msk.f32.mxu1 %vm2110_vm3, %v2108_v7  ;;  %v1844_v20 = vpack.c.bf16 %v814_v18, %v813_v17  ;;  %v791_v17 = vld [vmem:[#allocation5 + $0x38] sm:$0xff] }
 0x1bf   :  { %1799 = vmatprep.subr.bf16.mxu1 %v2109_v21 }
 0x1c2   :  { %1801 = vmatpush3.bf16.msra.mxu1 %v2369_v0 }
 0x1c3   :  { %1802 = vmatprep.subr.bf16.mxu1 %v2109_v21 }
 0x1c6   :  { %1804 = vmatpush3.bf16.msra.mxu1 %v2373_v3 }
 0x1c7   :  { %1805 = vmatprep.subr.bf16.mxu1 %v2109_v21 }
 0x1ca   :  { %1807 = vmatpush3.bf16.msra.mxu1 %v2377_v8 }
 0x1cb   :  { %1808 = vmatprep.subr.bf16.mxu1 %v2109_v21 }
 0x1ce   :  { %1810 = vmatpush3.bf16.msra.mxu1 %v2381_v13 }
 0x1cf   :  { %1811 = vmatprep.subr.bf16.mxu1 %v2109_v21 }
 0x1d2   :  { %1813 = vmatpush3.bf16.msra.mxu1 %v2385_v19 }
 0x1d3   :  { %1814 = vmatprep.subr.bf16.mxu1 %v2109_v21 }
 0x1d6   :  { %1816 = vmatpush3.bf16.msra.mxu1 %v2389_v25 }
 0x1d7   :  { %1817 = vmatprep.subr.bf16.mxu1 %v2109_v21 }
 0x1da   :  { %1819 = vmatpush3.bf16.msra.mxu1 %v2393_v31 }
 0x1db   :  { %1916 = vmatprep.subr.bf16.mxu1 %v2109_v21 }
 0x290   :  { %v638_v29 = vpop.f32.mrb[8].mxu1 }
 0x291   :  { %v645_v30 = vrot.slane %v638_v29, %v2404_v39  ;;  %v1504_v32 = vpop.f32.mrb[9].mxu1  ;;  %v1852_v29 = vpack.c.bf16 %v785_v28, %v784_v27  ;;  %v795_v27 = vld [vmem:[#allocation5 + $0x58] sm:$0xff] }
 0x293   :  { %v2434_v33 = vsub.f32 %v537_v58, %v645_v30  ;;  %v2436_v35 = vsub.f32 %v539_v48, %v645_v30  ;;  %v2438_v36 = vsub.f32 %v541_v59, %v645_v30  ;;  %v2440_v37 = vsub.f32 %v543_v6, %v645_v30  ;;  %v809_v6 = vld [vmem:[#allocation5 + $0xc0] sm:$0xff] }
 0x294   :  { %v1836_v11 = vpack.c.bf16 %v810_v10, %v809_v6  ;;  %v1856_v6 = vpack.c.bf16 %v787_v63, %v786_v62 }
 0x295   :  { %v650_v38 = vmul.f32 %v2434_v33, %v2434_v33  ;;  %v651_v42 = vmul.f32 %v2436_v35, %v2436_v35  ;;  %v652_v43 = vmul.f32 %v2438_v36, %v2438_v36  ;;  %v653_v45 = vmul.f32 %v2440_v37, %v2440_v37 }
 0x296   :  { %1837 = vmatprep.subr.bf16.mxu0 %v1836_v11 }
 0x297   :  { %v654_v44 = vadd.f32 %v651_v42, %v650_v38  ;;  %1839 = vmatpush3.bf16.msra.mxu0 %v1836_v11  ;;  %v545_v42 = vld [vmem:[%s2578_s8] sm:$0x1] }
 0x298   :  { %1841 = vmatprep.subr.bf16.mxu0 %v1840_v15 }
 0x299   :  { %v655_v46 = vadd.f32 %v654_v44, %v652_v43 }
 0x29b   :  { %v656_v50 = vadd.f32 %v655_v46, %v653_v45  ;;  %1843 = vmatpush3.bf16.msra.mxu0 %v1840_v15  ;;  %v1339_v46 = vld [vmem:[%s2579_s9] ss:$0 sm:$0xff]  ;;  %v790_v15 = vld [vmem:[#allocation5 + $0x30] sm:$0xff] }
 0x29c   :  { %1845 = vmatprep.subr.bf16.mxu0 %v1844_v20  ;;  %v1864_v18 = vpack.c.bf16 %v791_v17, %v790_v15  ;;  %v998_v17 = vld [vmem:[#allocation5 + $0x150] sm:$0xff] }
 0x29d   :  { %v657_v48 = vrot.slane %v656_v50, 4 }
 0x29f   :  { %v658_v52 = vadd.f32 %v657_v48, %v656_v50  ;;  %1847 = vmatpush3.bf16.msra.mxu0 %v1844_v20  ;;  %v792_v20 = vld [vmem:[#allocation5 + $0x40] sm:$0xff] }
 0x2a0   :  { %1849 = vmatprep.subr.bf16.mxu0 %v1848_v24  ;;  %v1868_v23 = vpack.c.bf16 %v793_v22, %v792_v20  ;;  %v1000_v20 = vld [vmem:[#allocation5 + $0x160] sm:$0xff]  ;;  %v1001_v22 = vld [vmem:[#allocation5 + $0x168] sm:$0xff] }
 0x2a1   :  { %v659_v54 = vrot.slane %v658_v52, 2 }
 0x2a3   :  { %v660_v56 = vadd.f32 %v659_v54, %v658_v52  ;;  %1851 = vmatpush3.bf16.msra.mxu0 %v1848_v24  ;;  %v794_v24 = vld [vmem:[#allocation5 + $0x50] sm:$0xff] }
 0x2a4   :  { %1853 = vmatprep.subr.bf16.mxu0 %v1852_v29  ;;  %v1872_v28 = vpack.c.bf16 %v795_v27, %v794_v24  ;;  %v1003_v24 = vld [vmem:[#allocation5 + $0x178] sm:$0xff] }
 0x2a5   :  { %v661_v58 = vrot.slane %v660_v56, 1 }
 0x2a7   :  { %v662_v59 = vadd.f32 %v661_v58, %v660_v56 }
 0x2a9   :  { %1538 = vmatmul.mubr.f32.vlgmr.msra.gmra.mrb[10].mxu1 %v662_v59 }
 0x2aa   :  { %1918 = vmatpush3.bf16.msra.mxu1 %v2365_v61  ;;  %1686 = vmatprep.mubr.msk.f32.mxu1 %vm2110_vm3, %v2108_v7 }
 0x2ab   :  { %1919 = vmatprep.subr.bf16.mxu1 %v2109_v21 }
 0x2ae   :  { %1921 = vmatpush3.bf16.msra.mxu1 %v2369_v0 }
 0x2af   :  { %1922 = vmatprep.subr.bf16.mxu1 %v2109_v21 }
 0x2b2   :  { %1924 = vmatpush3.bf16.msra.mxu1 %v2373_v3 }
 0x2b3   :  { %1925 = vmatprep.subr.bf16.mxu1 %v2109_v21 }
 0x2b6   :  { %1927 = vmatpush3.bf16.msra.mxu1 %v2377_v8 }
 0x2b7   :  { %1928 = vmatprep.subr.bf16.mxu1 %v2109_v21 }
 0x2ba   :  { %1930 = vmatpush3.bf16.msra.mxu1 %v2381_v13 }
 0x2bb   :  { %1931 = vmatprep.subr.bf16.mxu1 %v2109_v21 }
 0x2be   :  { %1933 = vmatpush3.bf16.msra.mxu1 %v2385_v19 }
 0x2bf   :  { %1934 = vmatprep.subr.bf16.mxu1 %v2109_v21 }
 0x2c2   :  { %1936 = vmatpush3.bf16.msra.mxu1 %v2389_v25 }
 0x2c3   :  { %1937 = vmatprep.subr.bf16.mxu1 %v2109_v21 }
 0x2c6   :  { %1939 = vmatpush3.bf16.msra.mxu1 %v2393_v31 }
 0x2c7   :  { %1940 = vmatprep.subr.bf16.mxu1 %v2109_v21 }
 0x37c   :  { %v729_v30 = vpop.f32.mrb[10].mxu1 }
 0x37d   :  { %v730_v32 = vadd.f32 1e-05, %v729_v30  ;;  %v1539_v38 = vpop.f32.mrb[11].mxu1 }
 0x37e   :  { %v799_v38 = vld [vmem:[#allocation5 + $0x78] sm:$0xff] }
 0x37f   :  { %2002 = vrsqrt.f32 %v730_v32  ;;  %v798_v32 = vld [vmem:[#allocation5 + $0x70] sm:$0xff] }
 0x389   :  { %v2003_v43 = vpop.eup %2002 }
 0x38a   :  { %v734_v44 = vmul.f32 %v2003_v43, %v545_v42  ;;  %v1880_v42 = vpack.c.bf16 %v799_v38, %v798_v32 }
 0x38c   :  { %v739_v45 = vrot.slane %v734_v44, %v2404_v39  ;;  %v988_v44 = vld [vmem:[#allocation5 + $0x100] sm:$0xff] }
 0x38e   :  { %v741_v50 = vmul.f32 %v739_v45, %v2434_v33  ;;  %v742_v48 = vmul.f32 %v739_v45, %v2436_v35  ;;  %v743_v52 = vmul.f32 %v739_v45, %v2438_v36  ;;  %v744_v54 = vmul.f32 %v739_v45, %v2440_v37  ;;  %v788_v36 = vld [vmem:[#allocation5 + $0x20] sm:$0xff]  ;;  %v789_v37 = vld [vmem:[#allocation5 + $0x28] sm:$0xff] }
 0x38f   :  { %v1860_v12 = vpack.c.bf16 %v789_v37, %v788_v36  ;;  %v989_v45 = vld [vmem:[#allocation5 + $0x108] sm:$0xff] }
 0x390   :  { %v751_v56 = vadd.f32 %v1339_v46, %v741_v50  ;;  %v752_v58 = vadd.f32 %v1339_v46, %v742_v48  ;;  %v753_v59 = vadd.f32 %v1339_v46, %v743_v52  ;;  %v754_v1 = vadd.f32 %v1339_v46, %v744_v54  ;;  %v990_v52 = vld [vmem:[#allocation5 + $0x110] sm:$0xff]  ;;  %v991_v54 = vld [vmem:[#allocation5 + $0x118] sm:$0xff]  ;;  %v993_v36 = vld [vmem:[#allocation5 + $0x128] sm:$0xff] }
 0x391   :  { %v1884_v50 = vpack.c.bf16 %v989_v45, %v988_v44  ;;  %v1888_v63 = vpack.c.bf16 %v991_v54, %v990_v52 }
 0x392   :  { %v2479_v2 = vmax.f32 %v751_v56, 0.0  ;;  %v2481_v4 = vmax.f32 %v752_v58, 0.0  ;;  %v2483_v5 = vmax.f32 %v754_v1, 0.0  ;;  %v2487_v35 = vmax.f32 %v753_v59, 0.0 }
 0x394   :  { %v760_v33 = vrot.slane %v2479_v2, 7  ;;  %1572 = vmatprep.mubr.f32.mxu0 %v2479_v2  ;;  %v763_v10 = vrot.slane %v2483_v5, 7  ;;  %v761_v43 = vrot.slane %v2481_v4, 7  ;;  %v762_v46 = vrot.slane %v2487_v35, 7 }
 0x395   :  { %1573 = vmatmul.mubr.f32.vlgmr.msra.gmra.mrb[8].mxu0 %v2481_v4  ;;  %v772_v56 = vrot.slane %v2479_v2, 1  ;;  %v773_v59 = vrot.slane %v2481_v4, 1 }
 0x396   :  { %1855 = vmatpush3.bf16.msra.mxu0 %v1852_v29  ;;  %1575 = vmatprep.mubr.f32.mxu0 %v2487_v35  ;;  %v767_v11 = vsel %vm102_vm0, %v763_v10, %v760_v33  ;;  %v796_v29 = vld [vmem:[#allocation5 + $0x60] sm:$0xff]  ;;  %v766_v48 = vsel %vm102_vm0, %v760_v33, %v761_v43  ;;  %v765_v58 = vsel %vm102_vm0, %v761_v43, %v762_v46 }
 0x397   :  { %1857 = vmatprep.subr.bf16.mxu0 %v1856_v6  ;;  %v768_v14 = vmul.f32 %v767_v11, %v2319_v26  ;;  %v797_v26 = vld [vmem:[#allocation5 + $0x68] sm:$0xff]  ;;  %v769_v62 = vmul.f32 %v766_v48, %v2323_v34  ;;  %v770_v1 = vmul.f32 %v765_v58, %v2328_v40  ;;  %v992_v33 = vld [vmem:[#allocation5 + $0x120] sm:$0xff]  ;;  %v778_v2 = vsel %vm135_vm1, %v772_v56, %v773_v59  ;;  %v994_v11 = vld [vmem:[#allocation5 + $0x130] sm:$0xff] }
 0x398   :  { %v1876_v30 = vpack.c.bf16 %v797_v26, %v796_v29  ;;  %v1892_v37 = vpack.c.bf16 %v993_v36, %v992_v33  ;;  %v780_v34 = vmul.f32 %v778_v2, %v2340_v51  ;;  %v1908_v51 = vpack.c.bf16 %v1001_v22, %v1000_v20  ;;  %v1341_v20 = vld [vmem:[%s2581_s11] ss:$0 sm:$0xff] }
 0x399   :  { %1576 = vmatmul.mubr.f32.gmra.mrb[10].mxu0 %v2483_v5  ;;  %v775_v29 = vrot.slane %v2483_v5, 1 }
 0x39a   :  { %1859 = vmatpush3.bf16.msra.mxu0 %v1856_v6  ;;  %1610 = vmatprep.mubr.f32.mxu0 %v768_v14  ;;  %v764_v6 = vsel %vm102_vm0, %v762_v46, %v763_v10  ;;  %v996_v10 = vld [vmem:[#allocation5 + $0x140] sm:$0xff]  ;;  %v997_v14 = vld [vmem:[#allocation5 + $0x148] sm:$0xff] }
 0x39b   :  { %1861 = vmatprep.subr.bf16.mxu0 %v1860_v12  ;;  %v771_v4 = vmul.f32 %v764_v6, %v2335_v49  ;;  %v1900_v15 = vpack.c.bf16 %v997_v14, %v996_v10 }
 0x39e   :  { %1863 = vmatpush3.bf16.msra.mxu0 %v1860_v12  ;;  %v995_v12 = vld [vmem:[#allocation5 + $0x138] sm:$0xff] }
 0x39f   :  { %1865 = vmatprep.subr.bf16.mxu0 %v1864_v18  ;;  %v1896_v40 = vpack.c.bf16 %v995_v12, %v994_v11 }
 0x3a2   :  { %1867 = vmatpush3.bf16.msra.mxu0 %v1864_v18  ;;  %v999_v18 = vld [vmem:[#allocation5 + $0x158] sm:$0xff] }
 0x3a3   :  { %1869 = vmatprep.subr.bf16.mxu0 %v1868_v23  ;;  %v1904_v49 = vpack.c.bf16 %v999_v18, %v998_v17 }
 0x3a6   :  { %1871 = vmatpush3.bf16.msra.mxu0 %v1868_v23  ;;  %v1002_v23 = vld [vmem:[#allocation5 + $0x170] sm:$0xff] }
 0x3a7   :  { %1873 = vmatprep.subr.bf16.mxu0 %v1872_v28  ;;  %v1912_v27 = vpack.c.bf16 %v1003_v24, %v1002_v23 }
 0x3aa   :  { %1875 = vmatpush3.bf16.msra.mxu0 %v1872_v28  ;;  %v774_v28 = vrot.slane %v2487_v35, 1  ;;  %v1340_v35 = vld [vmem:[%s2576_s6] ss:$0 sm:$0xff] }
 0x3ab   :  { %1877 = vmatprep.subr.bf16.mxu0 %v1876_v30 }
 0x3ac   :  { %v777_v26 = vsel %vm135_vm1, %v773_v59, %v774_v28 }
 0x3ad   :  { %v781_v32 = vmul.f32 %v777_v26, %v2346_v53 }
 0x3ae   :  { %1879 = vmatpush3.bf16.msra.mxu0 %v1876_v30  ;;  %v776_v30 = vsel %vm135_vm1, %v774_v28, %v775_v29 }
 0x3af   :  { %1881 = vmatprep.subr.bf16.mxu0 %v1880_v42  ;;  %v782_v38 = vmul.f32 %v776_v30, %v2352_v55 }
 0x3b2   :  { %1883 = vmatpush3.bf16.msra.mxu0 %v1880_v42  ;;  %v779_v42 = vsel %vm135_vm1, %v775_v29, %v772_v56 }
 0x3b3   :  { %1885 = vmatprep.subr.bf16.mxu0 %v1884_v50  ;;  %v783_v5 = vmul.f32 %v779_v42, %v2358_v57 }
 0x3b5   :  { %1611 = vmatmul.mubr.f32.vlgmr.msra.gmra.mrb[8].mxu0 %v769_v62 }
 0x3b6   :  { %1613 = vmatprep.mubr.f32.mxu0 %v770_v1  ;;  %1887 = vmatpush3.bf16.msra.mxu0 %v1884_v50 }
 0x3b7   :  { %1889 = vmatprep.subr.bf16.mxu0 %v1888_v63 }
 0x3b9   :  { %1614 = vmatmul.mubr.f32.gmra.mrb[10].mxu0 %v771_v4 }
 0x3ba   :  { %1891 = vmatpush3.bf16.msra.mxu0 %v1888_v63  ;;  %1648 = vmatprep.mubr.f32.mxu0 %v780_v34 }
 0x3bb   :  { %1893 = vmatprep.subr.bf16.mxu0 %v1892_v37 }
 0x3be   :  { %1895 = vmatpush3.bf16.msra.mxu0 %v1892_v37 }
 0x3bf   :  { %1897 = vmatprep.subr.bf16.mxu0 %v1896_v40 }
 0x3c2   :  { %1899 = vmatpush3.bf16.msra.mxu0 %v1896_v40 }
 0x3c3   :  { %1901 = vmatprep.subr.bf16.mxu0 %v1900_v15 }
 0x3c6   :  { %1903 = vmatpush3.bf16.msra.mxu0 %v1900_v15  ;;  %v1103_v15 = vld [vmem:[%s2580_s10] sm:$0x1]  ;;  %s2072_s10 = scalar_lea.vmem %s1315_s17, 512 }
 0x3c7   :  { %1905 = vmatprep.subr.bf16.mxu0 %v1904_v49  ;;  %p2073_p10 = scmp.ne.s32.totalorder %s1315_s17, %s2072_s10  ;;  %p2078_p12 = scmp.lt.s32.totalorder %s2072_s10, %s2072_s10 }
 0x3c9   :  { %p2079_p13 = por %p2078_p12, %p2077_p11 }
 0x3ca   :  { %1907 = vmatpush3.bf16.msra.mxu0 %v1904_v49 }
 0x3cb   :  { %1909 = vmatprep.subr.bf16.mxu0 %v1908_v51  ;;  %p2080_p0 = pnand %p2079_p13, %p2073_p10 }
 0x3ce   :  { %1911 = vmatpush3.bf16.msra.mxu0 %v1908_v51 }
 0x3cf   :  { %1913 = vmatprep.subr.bf16.mxu0 %v1912_v27 }
 0x3d2   :  { %1915 = vmatpush3.bf16.msra.mxu0 %v1912_v27 }
 0x3d5   :  { %1649 = vmatmul.mubr.f32.vlgmr.msra.gmra.mrb[8].mxu0 %v781_v32 }
 0x3d6   :  { %1651 = vmatprep.mubr.f32.mxu0 %v782_v38 }
 0x3d9   :  { %1652 = vmatmul.mubr.f32.gmra.mrb[10].mxu0 %v783_v5 }
 0x4a8   :  { %v1650_v43 = vpop.f32.mrb[8].mxu0 }
 0x4a9   :  { %v1070_v44 = vpop.f32.mrb[9].mxu0  ;;  %v1100_v45 = vadd.f32 %v1650_v43, %v1340_v35 }
 0x4aa   :  { %v1099_v46 = vadd.f32 %v1340_v35, %v1070_v44 }
 0x4ac   :  { %v1653_v50 = vpop.f32.mrb[10].mxu0  ;;  %v1105_v48 = vadd.f32 %v1100_v45, %v1099_v46 }
 0x4ad   :  { %v1080_v53 = vpop.f32.mrb[11].mxu0  ;;  %v1102_v52 = vadd.f32 %v1653_v50, %v1340_v35 }
 0x4ae   :  { %v1101_v55 = vadd.f32 %v1340_v35, %v1080_v53 }
 0x4b0   :  { %v1106_v16 = vadd.f32 %v1105_v48, %v1101_v55 }
 0x4b2   :  { %v1107_v54 = vadd.f32 %v1106_v16, %v1102_v52 }
 0x4b4   :  { %v1108_v56 = vrot.slane %v1107_v54, 4 }
 0x4b6   :  { %v1109_v58 = vadd.f32 %v1108_v56, %v1107_v54 }
 0x4b8   :  { %v1110_v59 = vrot.slane %v1109_v58, 2 }
 0x4ba   :  { %v1111_v57 = vadd.f32 %v1110_v59, %v1109_v58 }
 0x4bc   :  { %v1112_v62 = vrot.slane %v1111_v57, 1 }
 0x4be   :  { %v1113_v63 = vadd.f32 %v1112_v62, %v1111_v57 }
 0x4c0   :  { %1687 = vmatmul.mubr.f32.vlgmr.msra.gmra.mrb[12].mxu1 %v1113_v63 }
 0x4c1   :  { %1942 = vmatpush3.bf16.msra.mxu1 %v2365_v61  ;;  %1721 = vmatprep.mubr.msk.f32.mxu1 %vm2110_vm3, %v2108_v7 }
 0x4c2   :  { %1943 = vmatprep.subr.bf16.mxu1 %v2109_v21 }
 0x4c5   :  { %1945 = vmatpush3.bf16.msra.mxu1 %v2369_v0 }
 0x4c6   :  { %1946 = vmatprep.subr.bf16.mxu1 %v2109_v21 }
 0x4c9   :  { %1948 = vmatpush3.bf16.msra.mxu1 %v2373_v3 }
 0x4ca   :  { %1949 = vmatprep.subr.bf16.mxu1 %v2109_v21 }
 0x4cd   :  { %1951 = vmatpush3.bf16.msra.mxu1 %v2377_v8 }
 0x4ce   :  { %1952 = vmatprep.subr.bf16.mxu1 %v2109_v21 }
 0x4d1   :  { %1954 = vmatpush3.bf16.msra.mxu1 %v2381_v13 }
 0x4d2   :  { %1955 = vmatprep.subr.bf16.mxu1 %v2109_v21 }
 0x4d5   :  { %1957 = vmatpush3.bf16.msra.mxu1 %v2385_v19 }
 0x4d6   :  { %1958 = vmatprep.subr.bf16.mxu1 %v2109_v21 }
 0x4d9   :  { %1960 = vmatpush3.bf16.msra.mxu1 %v2389_v25 }
 0x4da   :  { %1961 = vmatprep.subr.bf16.mxu1 %v2109_v21 }
 0x4dd   :  { %1963 = vmatpush3.bf16.msra.mxu1 %v2393_v31 }
 0x593   :  { %v1180_v7 = vpop.f32.mrb[12].mxu1 }
 0x594   :  { %v1187_v61 = vrot.slane %v1180_v7, %v2404_v39  ;;  %v1688_v0 = vpop.f32.mrb[13].mxu1 }
 0x596   :  { %v1188_v3 = vsub.f32 %v1099_v46, %v1187_v61  ;;  %v1189_v8 = vsub.f32 %v1100_v45, %v1187_v61  ;;  %v1190_v1 = vsub.f32 %v1101_v55, %v1187_v61  ;;  %v1191_v13 = vsub.f32 %v1102_v52, %v1187_v61 }
 0x598   :  { %v1192_v6 = vmul.f32 %v1188_v3, %v1188_v3  ;;  %v1193_v33 = vmul.f32 %v1189_v8, %v1189_v8  ;;  %v1194_v36 = vmul.f32 %v1190_v1, %v1190_v1  ;;  %v1195_v2 = vmul.f32 %v1191_v13, %v1191_v13 }
 0x59a   :  { %v1196_v19 = vadd.f32 %v1193_v33, %v1192_v6 }
 0x59c   :  { %v1197_v4 = vadd.f32 %v1196_v19, %v1194_v36 }
 0x59e   :  { %v1198_v37 = vadd.f32 %v1197_v4, %v1195_v2 }
 0x5a0   :  { %v1199_v25 = vrot.slane %v1198_v37, 4 }
 0x5a2   :  { %v1200_v34 = vadd.f32 %v1199_v25, %v1198_v37 }
 0x5a4   :  { %v1201_v21 = vrot.slane %v1200_v34, 2 }
 0x5a6   :  { %v1202_v11 = vadd.f32 %v1201_v21, %v1200_v34 }
 0x5a8   :  { %v1203_v31 = vrot.slane %v1202_v11, 1 }
 0x5aa   :  { %v1204_v12 = vadd.f32 %v1203_v31, %v1202_v11 }
 0x5ac   :  { %1722 = vmatmul.mubr.f32.vlgmr.msra.gmra.mrb[14].mxu1 %v1204_v12 }
 0x67f   :  { %v1271_v40 = vpop.f32.mrb[14].mxu1 }
 0x680   :  { %v1272_v10 = vadd.f32 1e-05, %v1271_v40  ;;  %v1723_v14 = vpop.f32.mrb[15].mxu1 }
 0x682   :  { %2004 = vrsqrt.f32 %v1272_v10 }
 0x68c   :  { %v2005_v17 = vpop.eup %2004 }
 0x68d   :  { %v1276_v18 = vmul.f32 %v2005_v17, %v1103_v15 }
 0x68f   :  { %v1281_v49 = vrot.slane %v1276_v18, %v2404_v39 }
 0x691   :  { %v1283_v22 = vmul.f32 %v1281_v49, %v1188_v3  ;;  %v1284_v51 = vmul.f32 %v1281_v49, %v1189_v8  ;;  %v1285_v23 = vmul.f32 %v1281_v49, %v1190_v1  ;;  %v1286_v24 = vmul.f32 %v1281_v49, %v1191_v13 }
 0x693   :  { %v1293_v27 = vadd.f32 %v1341_v20, %v1283_v22  ;;  %v1294_v28 = vadd.f32 %v1341_v20, %v1284_v51  ;;  %v1295_v29 = vadd.f32 %v1341_v20, %v1285_v23  ;;  %v1296_v26 = vadd.f32 %v1341_v20, %v1286_v24 }
 0x695   :  { %v1297_v30 = vadd.f32 %v1293_v27, %v2406_v41  ;;  %v1298_v32 = vadd.f32 %v1294_v28, %v2409_v47  ;;  %v1299_v39 = vadd.f32 %v1295_v29, %v2411_v60  ;;  %v1300_v38 = vadd.f32 %v1296_v26, %v2413_v9 }
 0x697   :  { %v1301_v42 = vmax.f32 %v1297_v30, 0.0  ;;  %v1302_v5 = vmax.f32 %v1298_v32, 0.0  ;;  %v1303_v35 = vmax.f32 %v1299_v39, 0.0  ;;  %v1304_v43 = vmax.f32 %v1300_v38, 0.0 }
 0x699   :  { %1305 = vst [vmem:[#allocation8] sm:$0xff] %v1301_v42  ;;  %1306 = vst [vmem:[#allocation8 + $0x8] sm:$0xff] %v1302_v5 }
 0x69a   :  { %1307 = vst [vmem:[#allocation8 + $0x10] sm:$0xff] %v1303_v35  ;;  %1308 = vst [vmem:[#allocation8 + $0x18] sm:$0xff] %v1304_v43 }
 0x69b   :  { %2083 = shalt.err (!%p2080_p0)
}
 0x69c   :  { %s2084_s20 = scalar_lea.hbm %s2582_s12, 512 }
 0x69d   :  { %p2085_p1 = scmp.ne.s32.totalorder %s2582_s12, %s2084_s20  ;;  %p2088_p2 = scmp.lt.u32.totalorder %s2084_s20, %s2582_s12 }
 0x69f   :  { %p2090_p3 = pnand %p2088_p2, %p2085_p1 }
 0x6a1   :  { %2093 = shalt.err (!%p2090_p3)
}
 0x6a2   :  { %1320 = dma.vmem_to_hbm [thread:$0]  %s1315_s17, 512, %s2582_s12, [#allocation4], %s2101_s13, %s2101_s13, %s2102_s14  }
 0x6a3   :  { %2098 = dma.done.wait [#allocation4], 512  }
 0x6a4   :  { %2099 = vsyncadd [#allocation4], 4294966784 }
 0x6a5   :  { %1324 = vsyncpa [#allocation3], 1 }
 0x6a6   :  { %1325 = vsyncpa [#allocation6], 1 }
 0x6a7   :  { %1326 = vsyncpa [#allocation4], 1 }

</bundles_post_ra>
